<compile_context>
chip_gen: v7x
topology: tpu7x:2x2x1
jax: 0.10.0
libtpu: 0.0.40
codegen_flags: <defaults>
</compile_context>

<pallas_src>
import jax
import jax.numpy as jnp
from jax import lax
from jax.experimental import pallas as pl
from jax.experimental.pallas import tpu as pltpu


def _round_up(n, m):
    return ((n + m - 1) // m) * m


def enc_ph_kernel(x_ref, we_ref, be_ref, w1_ref, b1_ref, w2_ref, b2_ref, o_ref):
    # --- encoder stand-in: Linear(flat_dim -> dim_in), bf16 operands, f32 acc ---
    feat = jnp.dot(x_ref[...], we_ref[...],
                   preferred_element_type=jnp.float32) + be_ref[...]

    # --- head: Linear(dim_in, dim_in) -> ReLU -> Linear(dim_in, feat_dim) ---
    h = jnp.dot(feat.astype(jnp.bfloat16), w1_ref[...],
                preferred_element_type=jnp.float32) + b1_ref[...]
    h = jnp.maximum(h, 0.0)                          # ReLU (f32, VPU)
    z = jnp.dot(h.astype(jnp.bfloat16), w2_ref[...],
                preferred_element_type=jnp.float32) + b2_ref[...]

    # --- F.normalize(z, dim=1): z / max(||z||_2, 1e-12) via rsqrt (EUP) ---
    ssq = jnp.sum(z * z, axis=1, keepdims=True)
    # sqrt(max(ssq, 1e-24)) == max(||z||, 1e-12), so rsqrt gives the F.normalize scale.
    inv = lax.rsqrt(jnp.maximum(ssq, 1e-24))
    o_ref[...] = (z * inv).astype(o_ref.dtype)


def enc_ph_forward(x, params):
    """x: (B, C, H, W) float32. Returns (B, feat_dim) L2-normalized rows (f32)."""
    we, be, w1, b1, w2, b2 = params
    B = x.shape[0]
    flat_dim, dim_in = we.shape
    feat_dim = w2.shape[1]

    # Wrapper-side glue: NCHW flatten + bf16 cast of matmul operands
    # (halves HBM traffic; accumulation stays f32 inside the kernel).
    x_flat = x.reshape(B, -1).astype(jnp.bfloat16)
    we_bf = we.astype(jnp.bfloat16)
    w1_bf = w1.astype(jnp.bfloat16)
    w2_bf = w2.astype(jnp.bfloat16)
    be_f = be.astype(jnp.float32)
    b1_f = b1.astype(jnp.float32)
    b2_f = b2.astype(jnp.float32)

    # Batch tiling: at least 8 rows (f32 sublane), at most 128 rows per tile.
    TB = min(128, _round_up(B, 8))
    B_pad = _round_up(B, TB)
    if B_pad != B:
        x_flat = jnp.pad(x_flat, ((0, B_pad - B), (0, 0)))
    nb = B_pad // TB

    flops = 2 * B_pad * (flat_dim * dim_in + dim_in * dim_in + dim_in * feat_dim)
    bytes_accessed = (
        B_pad * flat_dim * 2                      # x (bf16)
        + (flat_dim * dim_in + dim_in * dim_in + dim_in * feat_dim) * 2  # weights (bf16)
        + (dim_in + dim_in + feat_dim) * 4        # biases (f32)
        + B_pad * feat_dim * 4                    # output (f32)
    )

    out = pl.pallas_call(
        enc_ph_kernel,
        out_shape=jax.ShapeDtypeStruct((B_pad, feat_dim), jnp.float32),
        grid_spec=pltpu.PrefetchScalarGridSpec(
            num_scalar_prefetch=0,
            grid=(nb,),
            in_specs=[
                pl.BlockSpec((TB, flat_dim), lambda i: (i, 0)),       # x tile
                pl.BlockSpec((flat_dim, dim_in), lambda i: (0, 0)),   # we (resident)
                pl.BlockSpec((1, dim_in), lambda i: (0, 0)),          # be
                pl.BlockSpec((dim_in, dim_in), lambda i: (0, 0)),     # w1 (resident)
                pl.BlockSpec((1, dim_in), lambda i: (0, 0)),          # b1
                pl.BlockSpec((dim_in, feat_dim), lambda i: (0, 0)),   # w2 (resident)
                pl.BlockSpec((1, feat_dim), lambda i: (0, 0)),        # b2
            ],
            out_specs=pl.BlockSpec((TB, feat_dim), lambda i: (i, 0)),
        ),
        compiler_params=pltpu.CompilerParams(
            dimension_semantics=("parallel",),        # shard batch tiles across TCs on v7x
            vmem_limit_bytes=32 * 1024 * 1024,        # fits v7x's 64 MiB with headroom
        ),
        cost_estimate=pl.CostEstimate(
            flops=flops, transcendentals=B_pad, bytes_accessed=bytes_accessed),
    )(x_flat, we_bf, be_f, w1_bf, b1_f, w2_bf, b2_f)

    return out[:B]


def make_params(key, flat_dim, dim_in, feat_dim):
    """Deterministic synthetic parameters (no checkpoint load)."""
    k0, k1, k2, k3, k4, k5 = jax.random.split(key, 6)
    we = jax.random.normal(k0, (flat_dim, dim_in), jnp.float32) * 0.02
    be = jax.random.normal(k1, (1, dim_in), jnp.float32) * 0.02
    w1 = jax.random.normal(k2, (dim_in, dim_in), jnp.float32) * 0.05
    b1 = jax.random.normal(k3, (1, dim_in), jnp.float32) * 0.05
    w2 = jax.random.normal(k4, (dim_in, feat_dim), jnp.float32) * 0.05
    b2 = jax.random.normal(k5, (1, feat_dim), jnp.float32) * 0.05
    return we, be, w1, b1, w2, b2


def enc_ph_ref_bf16(x, params):
    """Pure-JAX reference mirroring the kernel's bf16-operand / f32-accum math."""
    we, be, w1, b1, w2, b2 = params
    B = x.shape[0]
    xf = x.reshape(B, -1).astype(jnp.bfloat16)
    feat = jnp.dot(xf, we.astype(jnp.bfloat16),
                   preferred_element_type=jnp.float32) + be
    h = jnp.maximum(jnp.dot(feat.astype(jnp.bfloat16), w1.astype(jnp.bfloat16),
                            preferred_element_type=jnp.float32) + b1, 0.0)
    z = jnp.dot(h.astype(jnp.bfloat16), w2.astype(jnp.bfloat16),
                preferred_element_type=jnp.float32) + b2
    norm = jnp.sqrt(jnp.sum(z * z, axis=1, keepdims=True))
    return z / jnp.maximum(norm, 1e-12)


def enc_ph_ref_f32(x, params):
    """Full-precision reference (matches the PyTorch module's f32 math)."""
    we, be, w1, b1, w2, b2 = params
    B = x.shape[0]
    feat = x.reshape(B, -1) @ we + be
    h = jnp.maximum(feat @ w1 + b1, 0.0)
    z = h @ w2 + b2
    norm = jnp.sqrt(jnp.sum(z * z, axis=1, keepdims=True))
    return z / jnp.maximum(norm, 1e-12)


if __name__ == "__main__":
    # Small shapes consistent with the module's forward:
    #   x: (B=2, C=4, H=16, W=16) NCHW image
    #   dim_in = model.resnet.fc.out_features -> 128 (synthetic)
    #   feat_dim = 128 (module default)
    B, C, H, W = 2, 4, 16, 16
    dim_in, feat_dim = 128, 128
    flat_dim = C * H * W

    key = jax.random.PRNGKey(0)
    kx, kp = jax.random.split(key)
    x = jax.random.normal(kx, (B, C, H, W), jnp.float32)
    params = make_params(kp, flat_dim, dim_in, feat_dim)

    fwd = jax.jit(enc_ph_forward)
    out = jax.block_until_ready(fwd(x, params))

    assert out.shape == (B, feat_dim)
    assert bool(jnp.all(jnp.isfinite(out)))
    # Tight check against a reference using the same bf16-operand math.
    ref_bf = enc_ph_ref_bf16(x, params)
    assert jnp.allclose(out, ref_bf, atol=2e-3, rtol=2e-3)
    # Loose sanity check against the full-f32 PyTorch-equivalent math
    # (bf16 matmul operands -> small but nonzero deviation on unit-norm rows).
    ref_f32 = enc_ph_ref_f32(x, params)
    assert float(jnp.max(jnp.abs(out - ref_f32))) < 5e-2
    # Rows should be unit-norm (normalization is done in f32).
    assert jnp.allclose(jnp.linalg.norm(out, axis=1), 1.0, atol=1e-4)

    print("KERNEL_OK")
</pallas_src>

<mosaic_0001>
module attributes {stable_mosaic.version = 11 : i64} {
  func.func @enc_ph_kernel(%arg0: i32, %arg1: memref<8x1024xbf16, #tpu.memory_space<vmem>>, %arg2: memref<1024x128xbf16, #tpu.memory_space<vmem>>, %arg3: memref<1x128xf32, #tpu.memory_space<vmem>>, %arg4: memref<128x128xbf16, #tpu.memory_space<vmem>>, %arg5: memref<1x128xf32, #tpu.memory_space<vmem>>, %arg6: memref<128x128xbf16, #tpu.memory_space<vmem>>, %arg7: memref<1x128xf32, #tpu.memory_space<vmem>>, %arg8: memref<8x128xf32, #tpu.memory_space<vmem>>) attributes {dimension_semantics = [#tpu.dimension_semantics<parallel>], iteration_bounds = array<i64: 1>, scalar_prefetch = 0 : i64, scratch_operands = 0 : i64, tpu.core_type = #tpu.core_type<tc>, window_params = [{transform_indices = @transform_0, window_bounds = array<i64: 8, 1024>}, {pipeline_mode = #tpu.pipeline_mode<synchronous>, transform_indices = @transform_1, window_bounds = array<i64: 1024, 128>}, {pipeline_mode = #tpu.pipeline_mode<synchronous>, transform_indices = @transform_2, window_bounds = array<i64: 1, 128>}, {pipeline_mode = #tpu.pipeline_mode<synchronous>, transform_indices = @transform_3, window_bounds = array<i64: 128, 128>}, {pipeline_mode = #tpu.pipeline_mode<synchronous>, transform_indices = @transform_4, window_bounds = array<i64: 1, 128>}, {pipeline_mode = #tpu.pipeline_mode<synchronous>, transform_indices = @transform_5, window_bounds = array<i64: 128, 128>}, {pipeline_mode = #tpu.pipeline_mode<synchronous>, transform_indices = @transform_6, window_bounds = array<i64: 1, 128>}, {transform_indices = @transform_7, window_bounds = array<i64: 8, 128>}]} {
    %c0 = arith.constant 0 : index
    %c0_0 = arith.constant 0 : index
    %0 = vector.load %arg1[%c0, %c0_0] : memref<8x1024xbf16, #tpu.memory_space<vmem>>, vector<8x1024xbf16>
    %c0_1 = arith.constant 0 : index
    %c0_2 = arith.constant 0 : index
    %1 = vector.load %arg2[%c0_1, %c0_2] : memref<1024x128xbf16, #tpu.memory_space<vmem>>, vector<1024x128xbf16>
    %cst = arith.constant dense<0.000000e+00> : vector<8x128xf32>
    %2 = tpu.matmul %0, %1, %cst {dimension_numbers = #tpu.dot_dimension_numbers<[1], [0], [0], [1], [0, 0, 1, 1], [], []>} : vector<8x1024xbf16>, vector<1024x128xbf16>, vector<8x128xf32> -> vector<8x128xf32>
    %c0_3 = arith.constant 0 : index
    %c0_4 = arith.constant 0 : index
    %3 = vector.load %arg3[%c0_3, %c0_4] : memref<1x128xf32, #tpu.memory_space<vmem>>, vector<1x128xf32>
    %4 = vector.broadcast %3 : vector<1x128xf32> to vector<8x128xf32>
    %5 = arith.addf %2, %4 : vector<8x128xf32>
    %6 = arith.truncf %5 : vector<8x128xf32> to vector<8x128xbf16>
    %c0_5 = arith.constant 0 : index
    %c0_6 = arith.constant 0 : index
    %7 = vector.load %arg4[%c0_5, %c0_6] : memref<128x128xbf16, #tpu.memory_space<vmem>>, vector<128x128xbf16>
    %cst_7 = arith.constant dense<0.000000e+00> : vector<8x128xf32>
    %8 = tpu.matmul %6, %7, %cst_7 {dimension_numbers = #tpu.dot_dimension_numbers<[1], [0], [0], [1], [0, 0, 1, 1], [], []>} : vector<8x128xbf16>, vector<128x128xbf16>, vector<8x128xf32> -> vector<8x128xf32>
    %c0_8 = arith.constant 0 : index
    %c0_9 = arith.constant 0 : index
    %9 = vector.load %arg5[%c0_8, %c0_9] : memref<1x128xf32, #tpu.memory_space<vmem>>, vector<1x128xf32>
    %10 = vector.broadcast %9 : vector<1x128xf32> to vector<8x128xf32>
    %11 = arith.addf %8, %10 : vector<8x128xf32>
    %cst_10 = arith.constant 0.000000e+00 : f32
    %12 = vector.broadcast %cst_10 : f32 to vector<8x128xf32>
    %13 = arith.maximumf %11, %12 : vector<8x128xf32>
    %14 = arith.truncf %13 : vector<8x128xf32> to vector<8x128xbf16>
    %c0_11 = arith.constant 0 : index
    %c0_12 = arith.constant 0 : index
    %15 = vector.load %arg6[%c0_11, %c0_12] : memref<128x128xbf16, #tpu.memory_space<vmem>>, vector<128x128xbf16>
    %cst_13 = arith.constant dense<0.000000e+00> : vector<8x128xf32>
    %16 = tpu.matmul %14, %15, %cst_13 {dimension_numbers = #tpu.dot_dimension_numbers<[1], [0], [0], [1], [0, 0, 1, 1], [], []>} : vector<8x128xbf16>, vector<128x128xbf16>, vector<8x128xf32> -> vector<8x128xf32>
    %c0_14 = arith.constant 0 : index
    %c0_15 = arith.constant 0 : index
    %17 = vector.load %arg7[%c0_14, %c0_15] : memref<1x128xf32, #tpu.memory_space<vmem>>, vector<1x128xf32>
    %18 = vector.broadcast %17 : vector<1x128xf32> to vector<8x128xf32>
    %19 = arith.addf %16, %18 : vector<8x128xf32>
    %20 = arith.mulf %19, %19 : vector<8x128xf32>
    %cst_16 = arith.constant dense<0.000000e+00> : vector<8xf32>
    %21 = vector.multi_reduction <add>, %20, %cst_16 [1] : vector<8x128xf32> to vector<8xf32>
    %22 = vector.shape_cast %21 : vector<8xf32> to vector<8x1xf32>
    %cst_17 = arith.constant 1.000000e-24 : f32
    %23 = vector.broadcast %cst_17 : f32 to vector<8x1xf32>
    %24 = arith.maximumf %22, %23 : vector<8x1xf32>
    %25 = math.rsqrt %24 : vector<8x1xf32>
    %26 = vector.broadcast %25 : vector<8x1xf32> to vector<8x128xf32>
    %27 = arith.mulf %19, %26 : vector<8x128xf32>
    %c0_18 = arith.constant 0 : index
    %c0_19 = arith.constant 0 : index
    %28 = vector.load %arg8[%c0_18, %c0_19] : memref<8x128xf32, #tpu.memory_space<vmem>>, vector<8x128xf32>
    tpu.vector_store %arg8[%c0_18, %c0_19], %27 {strides = array<i32>} : memref<8x128xf32, #tpu.memory_space<vmem>>, vector<8x128xf32>,
    return
  }
  func.func @transform_0(%arg0: i32) -> (i32, i32) {
    %c0_i32 = arith.constant 0 : i32
    %c0_i32_0 = arith.constant 0 : i32
    return %arg0, %c0_i32 : i32, i32
  }
  func.func @transform_1(%arg0: i32) -> (i32, i32) {
    %c0_i32 = arith.constant 0 : i32
    %c0_i32_0 = arith.constant 0 : i32
    %c0_i32_1 = arith.constant 0 : i32
    return %c0_i32, %c0_i32_0 : i32, i32
  }
  func.func @transform_2(%arg0: i32) -> (i32, i32) {
    %c0_i32 = arith.constant 0 : i32
    %c0_i32_0 = arith.constant 0 : i32
    %c0_i32_1 = arith.constant 0 : i32
    return %c0_i32, %c0_i32_0 : i32, i32
  }
  func.func @transform_3(%arg0: i32) -> (i32, i32) {
    %c0_i32 = arith.constant 0 : i32
    %c0_i32_0 = arith.constant 0 : i32
    %c0_i32_1 = arith.constant 0 : i32
    return %c0_i32, %c0_i32_0 : i32, i32
  }
  func.func @transform_4(%arg0: i32) -> (i32, i32) {
    %c0_i32 = arith.constant 0 : i32
    %c0_i32_0 = arith.constant 0 : i32
    %c0_i32_1 = arith.constant 0 : i32
    return %c0_i32, %c0_i32_0 : i32, i32
  }
  func.func @transform_5(%arg0: i32) -> (i32, i32) {
    %c0_i32 = arith.constant 0 : i32
    %c0_i32_0 = arith.constant 0 : i32
    %c0_i32_1 = arith.constant 0 : i32
    return %c0_i32, %c0_i32_0 : i32, i32
  }
  func.func @transform_6(%arg0: i32) -> (i32, i32) {
    %c0_i32 = arith.constant 0 : i32
    %c0_i32_0 = arith.constant 0 : i32
    %c0_i32_1 = arith.constant 0 : i32
    return %c0_i32, %c0_i32_0 : i32, i32
  }
  func.func @transform_7(%arg0: i32) -> (i32, i32) {
    %c0_i32 = arith.constant 0 : i32
    %c0_i32_0 = arith.constant 0 : i32
    return %arg0, %c0_i32 : i32, i32
  }
}

</mosaic_0001>

<bundles_post_ra>
// kernel: enc_ph_forward.1
= control target key start
LH: loop header
LB: loop body
LE: loop exit
PB: predicated region body
PF: predicated region fallthrough
CT: control target
= control target key end

     0   :  { %vm1304_vm0 = vmmov 0   ;;  %s1627_s1 = inlined_call_operand.vmem [shape: bf16[1024,128], index: 1, kind: input, shape index: {}]   ;;  %s1628_s0 = inlined_call_operand.vmem [shape: bf16[8,1024], index: 0, kind: input, shape index: {}]   ;;  %s1629_s3 = inlined_call_operand.vmem [shape: bf16[128,128], index: 3, kind: input, shape index: {}]   ;;  %s1630_s5 = inlined_call_operand.vmem [shape: bf16[128,128], index: 5, kind: input, shape index: {}]   ;;  %s1631_s2 = inlined_call_operand.vmem [shape: f32[1,128], index: 2, kind: input, shape index: {}]   ;;  %s1632_s4 = inlined_call_operand.vmem [shape: f32[1,128], index: 4, kind: input, shape index: {}]   ;;  %s1633_s6 = inlined_call_operand.vmem [shape: f32[1,128], index: 6, kind: input, shape index: {}]   ;;  %s1634_s7 = inlined_call_operand.vmem [shape: f32[8,128], index: 7, kind: output, shape index: {}]  }
   0x1   :  { %v1213_v0 = vld [vmem:[%s1627_s1 + $0x40] sm:$0xff]   ;;  %v1217_v4 = vld [vmem:[%s1627_s1 + $0x48] sm:$0xff]   ;;  %v1221_v8 = vld [vmem:[%s1627_s1 + $0x50] sm:$0xff]  }
   0x2   :  { %v1214_v1 = vld [vmem:[%s1627_s1 + $0xc0] sm:$0xff]   ;;  %1065 = vmatprep.subr.bf16.mxu0 %v1213_v0  ;;  %v1218_v5 = vld [vmem:[%s1627_s1 + $0xc8] sm:$0xff]   ;;  %v1222_v9 = vld [vmem:[%s1627_s1 + $0xd0] sm:$0xff]  }
   0x3   :  { %v1215_v2 = vld [vmem:[%s1627_s1] sm:$0xff]   ;;  %1087 = vmatprep.subr.bf16.mxu1 %v1214_v1  ;;  %v1219_v6 = vld [vmem:[%s1627_s1 + $0x8] sm:$0xff]   ;;  %v1223_v10 = vld [vmem:[%s1627_s1 + $0x10] sm:$0xff]  }
   0x4   :  { %v1216_v3 = vld [vmem:[%s1627_s1 + $0x80] sm:$0xff]   ;;  %1066 = vmatpush3.bf16.msra.mxu0 %v1215_v2  ;;  %v1220_v7 = vld [vmem:[%s1627_s1 + $0x88] sm:$0xff]   ;;  %v1224_v11 = vld [vmem:[%s1627_s1 + $0x90] sm:$0xff]  }
   0x5   :  { %1088 = vmatpush3.bf16.msra.mxu1 %v1216_v3  ;;  %1067 = vmatprep.subr.bf16.mxu0 %v1217_v4  ;;  %v1225_v12 = vld [vmem:[%s1627_s1 + $0x58] sm:$0xff]   ;;  %v1229_v16 = vld [vmem:[%s1627_s1 + $0x60] sm:$0xff]   ;;  %v1233_v20 = vld [vmem:[%s1627_s1 + $0x68] sm:$0xff]  }
   0x6   :  { %1089 = vmatprep.subr.bf16.mxu1 %v1218_v5  ;;  %v1226_v13 = vld [vmem:[%s1627_s1 + $0xd8] sm:$0xff]   ;;  %v1230_v17 = vld [vmem:[%s1627_s1 + $0xe0] sm:$0xff]   ;;  %v1234_v21 = vld [vmem:[%s1627_s1 + $0xe8] sm:$0xff]  }
   0x7   :  { %v1227_v14 = vld [vmem:[%s1627_s1 + $0x18] sm:$0xff]   ;;  %v1231_v18 = vld [vmem:[%s1627_s1 + $0x20] sm:$0xff]   ;;  %v1235_v22 = vld [vmem:[%s1627_s1 + $0x28] sm:$0xff]  }
   0x8   :  { %1068 = vmatpush3.bf16.msra.mxu0 %v1219_v6  ;;  %v1228_v15 = vld [vmem:[%s1627_s1 + $0x98] sm:$0xff]   ;;  %v1232_v19 = vld [vmem:[%s1627_s1 + $0xa0] sm:$0xff]   ;;  %v1236_v23 = vld [vmem:[%s1627_s1 + $0xa8] sm:$0xff]  }
   0x9   :  { %1090 = vmatpush3.bf16.msra.mxu1 %v1220_v7  ;;  %1069 = vmatprep.subr.bf16.mxu0 %v1221_v8  ;;  %v1237_v24 = vld [vmem:[%s1627_s1 + $0x70] sm:$0xff]   ;;  %v1241_v28 = vld [vmem:[%s1627_s1 + $0x78] sm:$0xff]   ;;  %v27_v32 = vld [vmem:[%s1628_s0] sm:$0xff] }
   0xa   :  { %1091 = vmatprep.subr.bf16.mxu1 %v1222_v9  ;;  %v1238_v25 = vld [vmem:[%s1627_s1 + $0xf0] sm:$0xff]   ;;  %v1242_v29 = vld [vmem:[%s1627_s1 + $0xf8] sm:$0xff]   ;;  %v28_v33 = vld [vmem:[%s1628_s0 + $0x8] sm:$0xff]  ;;  %v975_v34 = vcombine.low %v27_v32, %v27_v32  ;;  %v976_v35 = vcombine.high %v27_v32, %v27_v32 }
   0xb   :  { %v1239_v26 = vld [vmem:[%s1627_s1 + $0x30] sm:$0xff]   ;;  %v1243_v30 = vld [vmem:[%s1627_s1 + $0x38] sm:$0xff]   ;;  %v977_v36 = vcombine.low %v28_v33, %v28_v33  ;;  %v978_v37 = vcombine.high %v28_v33, %v28_v33  ;;  %v1249_v38 = vld [vmem:[%s1627_s1 + $0x140] sm:$0xff]  }
   0xc   :  { %1070 = vmatpush3.bf16.msra.mxu0 %v1223_v10  ;;  %v1240_v27 = vld [vmem:[%s1627_s1 + $0xb0] sm:$0xff]   ;;  %v1244_v31 = vld [vmem:[%s1627_s1 + $0xb8] sm:$0xff]   ;;  %v1250_v39 = vld [vmem:[%s1627_s1 + $0x1c0] sm:$0xff]   ;;  %610 = vmatprep.mubr.bf16.mxu0 %v976_v35 }
   0xd   :  { %1092 = vmatpush3.bf16.msra.mxu1 %v1224_v11  ;;  %1071 = vmatprep.subr.bf16.mxu0 %v1225_v12  ;;  %v1251_v40 = vld [vmem:[%s1627_s1 + $0x100] sm:$0xff]   ;;  %v1253_v42 = vld [vmem:[%s1627_s1 + $0x148] sm:$0xff]   ;;  %v1257_v46 = vld [vmem:[%s1627_s1 + $0x150] sm:$0xff]   ;;  %v1303_v12 = vmov 0.0  }
   0xe   :  { %1093 = vmatprep.subr.bf16.mxu1 %v1226_v13  ;;  %650 = vmatprep.mubr.bf16.mxu1 %v978_v37  ;;  %v1252_v41 = vld [vmem:[%s1627_s1 + $0x180] sm:$0xff]   ;;  %v1254_v43 = vld [vmem:[%s1627_s1 + $0x1c8] sm:$0xff]   ;;  %v1258_v47 = vld [vmem:[%s1627_s1 + $0x1d0] sm:$0xff]  }
   0xf   :  { %v1255_v44 = vld [vmem:[%s1627_s1 + $0x108] sm:$0xff]   ;;  %v1259_v48 = vld [vmem:[%s1627_s1 + $0x110] sm:$0xff]   ;;  %v1261_v50 = vld [vmem:[%s1627_s1 + $0x158] sm:$0xff]  }
  0x10   :  { %1072 = vmatpush3.bf16.msra.mxu0 %v1227_v14  ;;  %v1256_v45 = vld [vmem:[%s1627_s1 + $0x188] sm:$0xff]   ;;  %v1260_v49 = vld [vmem:[%s1627_s1 + $0x190] sm:$0xff]   ;;  %v1262_v51 = vld [vmem:[%s1627_s1 + $0x1d8] sm:$0xff]  }
  0x11   :  { %1094 = vmatpush3.bf16.msra.mxu1 %v1228_v15  ;;  %1073 = vmatprep.subr.bf16.mxu0 %v1229_v16  ;;  %v1263_v52 = vld [vmem:[%s1627_s1 + $0x118] sm:$0xff]   ;;  %v1265_v54 = vld [vmem:[%s1627_s1 + $0x160] sm:$0xff]   ;;  %v1269_v58 = vld [vmem:[%s1627_s1 + $0x168] sm:$0xff]  }
  0x12   :  { %1095 = vmatprep.subr.bf16.mxu1 %v1230_v17  ;;  %v1264_v53 = vld [vmem:[%s1627_s1 + $0x198] sm:$0xff]   ;;  %v1266_v55 = vld [vmem:[%s1627_s1 + $0x1e0] sm:$0xff]   ;;  %v1270_v59 = vld [vmem:[%s1627_s1 + $0x1e8] sm:$0xff]  }
  0x13   :  { %v1267_v56 = vld [vmem:[%s1627_s1 + $0x120] sm:$0xff]   ;;  %v1271_v60 = vld [vmem:[%s1627_s1 + $0x128] sm:$0xff]   ;;  %v1273_v62 = vld [vmem:[%s1627_s1 + $0x170] sm:$0xff]  }
  0x14   :  { %1074 = vmatpush3.bf16.msra.mxu0 %v1231_v18  ;;  %v1268_v57 = vld [vmem:[%s1627_s1 + $0x1a0] sm:$0xff]   ;;  %v1272_v61 = vld [vmem:[%s1627_s1 + $0x1a8] sm:$0xff]   ;;  %v1274_v63 = vld [vmem:[%s1627_s1 + $0x1f0] sm:$0xff]  }
  0x15   :  { %1096 = vmatpush3.bf16.msra.mxu1 %v1232_v19  ;;  %1075 = vmatprep.subr.bf16.mxu0 %v1233_v20  ;;  %v1275_v0 = vld [vmem:[%s1627_s1 + $0x130] sm:$0xff]   ;;  %v1277_v2 = vld [vmem:[%s1627_s1 + $0x178] sm:$0xff]   ;;  %v1285_v13 = vld [vmem:[%s1629_s3] sm:$0xff]  }
  0x16   :  { %1097 = vmatprep.subr.bf16.mxu1 %v1234_v21  ;;  %v1276_v1 = vld [vmem:[%s1627_s1 + $0x1b0] sm:$0xff]   ;;  %v1278_v3 = vld [vmem:[%s1627_s1 + $0x1f8] sm:$0xff]   ;;  %v1286_v14 = vld [vmem:[%s1629_s3 + $0x8] sm:$0xff]  }
  0x17   :  { %v1279_v4 = vld [vmem:[%s1627_s1 + $0x138] sm:$0xff]   ;;  %v29_v6 = vld [vmem:[%s1628_s0 + $0x10] sm:$0xff]  ;;  %v1289_v17 = vld [vmem:[%s1629_s3 + $0x20] sm:$0xff]  }
  0x18   :  { %1076 = vmatpush3.bf16.msra.mxu0 %v1235_v22  ;;  %v1280_v5 = vld [vmem:[%s1627_s1 + $0x1b8] sm:$0xff]   ;;  %v979_v7 = vcombine.low %v29_v6, %v29_v6  ;;  %v980_v8 = vcombine.high %v29_v6, %v29_v6  ;;  %v1287_v15 = vld [vmem:[%s1629_s3 + $0x10] sm:$0xff]   ;;  %v1290_v18 = vld [vmem:[%s1629_s3 + $0x28] sm:$0xff]  }
  0x19   :  { %1098 = vmatpush3.bf16.msra.mxu1 %v1236_v23  ;;  %1077 = vmatprep.subr.bf16.mxu0 %v1237_v24  ;;  %v30_v9 = vld [vmem:[%s1628_s0 + $0x18] sm:$0xff]  ;;  %v1291_v19 = vld [vmem:[%s1629_s3 + $0x30] sm:$0xff]   ;;  %v1293_v21 = vld [vmem:[%s1630_s5] sm:$0xff]  }
  0x1a   :  { %1099 = vmatprep.subr.bf16.mxu1 %v1238_v25  ;;  %v981_v10 = vcombine.low %v30_v9, %v30_v9  ;;  %v982_v11 = vcombine.high %v30_v9, %v30_v9  ;;  %v1288_v16 = vld [vmem:[%s1629_s3 + $0x18] sm:$0xff]   ;;  %v1294_v22 = vld [vmem:[%s1630_s5 + $0x8] sm:$0xff]   ;;  %v1295_v23 = vld [vmem:[%s1630_s5 + $0x10] sm:$0xff]  }
  0x1b   :  { %v1292_v20 = vld [vmem:[%s1629_s3 + $0x38] sm:$0xff]   ;;  %v1297_v25 = vld [vmem:[%s1630_s5 + $0x20] sm:$0xff]  }
  0x1c   :  { %1078 = vmatpush3.bf16.msra.mxu0 %v1239_v26  ;;  %v1296_v24 = vld [vmem:[%s1630_s5 + $0x18] sm:$0xff]   ;;  %v1298_v26 = vld [vmem:[%s1630_s5 + $0x28] sm:$0xff]  }
  0x1d   :  { %1100 = vmatpush3.bf16.msra.mxu1 %v1240_v27  ;;  %1079 = vmatprep.subr.bf16.mxu0 %v1241_v28 }
  0x1e   :  { %1101 = vmatprep.subr.bf16.mxu1 %v1242_v29  ;;  %v974_v29 = vld [vmem:[%s1631_s2] ss:$0 sm:$0xff] }
  0x20   :  { %1080 = vmatpush3.bf16.msra.mxu0 %v1243_v30 }
  0x21   :  { %1102 = vmatpush3.bf16.msra.mxu1 %v1244_v31  ;;  %1109 = vmatprep.subr.bf16.mxu0 %v1249_v38 }
  0x22   :  { %1131 = vmatprep.subr.bf16.mxu1 %v1250_v39 }
  0x23   :  { %611 = vmatmul.mubr.bf16.vlgmr.msra.gmra.mrb[0].mxu0 %v975_v34 }
  0x24   :  { %651 = vmatmul.mubr.bf16.vlgmr.msra.gmra.mrb[0].mxu1 %v977_v36  ;;  %1110 = vmatpush3.bf16.msra.mxu0 %v1251_v40 }
  0x25   :  { %1132 = vmatpush3.bf16.msra.mxu1 %v1252_v41  ;;  %1111 = vmatprep.subr.bf16.mxu0 %v1253_v42 }
  0x26   :  { %1133 = vmatprep.subr.bf16.mxu1 %v1254_v43  ;;  %690 = vmatprep.mubr.bf16.mxu0 %v980_v8 }
  0x27   :  { %730 = vmatprep.mubr.bf16.mxu1 %v982_v11 }
  0x28   :  { %1112 = vmatpush3.bf16.msra.mxu0 %v1255_v44 }
  0x29   :  { %1134 = vmatpush3.bf16.msra.mxu1 %v1256_v45  ;;  %1113 = vmatprep.subr.bf16.mxu0 %v1257_v46 }
  0x2a   :  { %1135 = vmatprep.subr.bf16.mxu1 %v1258_v47 }
  0x2c   :  { %1114 = vmatpush3.bf16.msra.mxu0 %v1259_v48 }
  0x2d   :  { %1136 = vmatpush3.bf16.msra.mxu1 %v1260_v49  ;;  %1115 = vmatprep.subr.bf16.mxu0 %v1261_v50 }
  0x2e   :  { %1137 = vmatprep.subr.bf16.mxu1 %v1262_v51 }
  0x30   :  { %1116 = vmatpush3.bf16.msra.mxu0 %v1263_v52 }
  0x31   :  { %1138 = vmatpush3.bf16.msra.mxu1 %v1264_v53  ;;  %1117 = vmatprep.subr.bf16.mxu0 %v1265_v54  ;;  %v1299_v53 = vld [vmem:[%s1630_s5 + $0x30] sm:$0xff]   ;;  %v1300_v54 = vld [vmem:[%s1630_s5 + $0x38] sm:$0xff]  }
  0x32   :  { %1139 = vmatprep.subr.bf16.mxu1 %v1266_v55  ;;  %v1047_v55 = vld [vmem:[%s1632_s4] ss:$0 sm:$0xff] }
  0x34   :  { %1118 = vmatpush3.bf16.msra.mxu0 %v1267_v56 }
  0x35   :  { %1140 = vmatpush3.bf16.msra.mxu1 %v1268_v57  ;;  %1119 = vmatprep.subr.bf16.mxu0 %v1269_v58 }
  0x36   :  { %1141 = vmatprep.subr.bf16.mxu1 %v1270_v59 }
  0x38   :  { %1120 = vmatpush3.bf16.msra.mxu0 %v1271_v60 }
  0x39   :  { %1142 = vmatpush3.bf16.msra.mxu1 %v1272_v61  ;;  %1121 = vmatprep.subr.bf16.mxu0 %v1273_v62 }
  0x3a   :  { %1143 = vmatprep.subr.bf16.mxu1 %v1274_v63  ;;  %v1056_v63 = vld [vmem:[%s1633_s6] ss:$0 sm:$0xff] }
  0x3c   :  { %1122 = vmatpush3.bf16.msra.mxu0 %v1275_v0 }
  0x3d   :  { %1144 = vmatpush3.bf16.msra.mxu1 %v1276_v1  ;;  %1123 = vmatprep.subr.bf16.mxu0 %v1277_v2 }
  0x3e   :  { %1145 = vmatprep.subr.bf16.mxu1 %v1278_v3 }
  0x40   :  { %1124 = vmatpush3.bf16.msra.mxu0 %v1279_v4 }
  0x41   :  { %1146 = vmatpush3.bf16.msra.mxu1 %v1280_v5  ;;  %1171 = vmatprep.subr.bf16.mxu0 %v1303_v12 }
  0x42   :  { %1191 = vmatprep.subr.bf16.mxu1 %v1303_v12 }
  0x43   :  { %691 = vmatmul.mubr.bf16.vlgmr.msra.gmra.mrb[4].mxu0 %v979_v7 }
  0x44   :  { %731 = vmatmul.mubr.bf16.vlgmr.msra.gmra.mrb[4].mxu1 %v981_v10  ;;  %1172 = vmatpush3.bf16.msra.mxu0 %v1285_v13 }
  0x45   :  { %1173 = vmatprep.subr.bf16.mxu0 %v1303_v12  ;;  %1187 = vmatprep.mubr.msk.bf16.mxu0 %vm1304_vm0, %v1303_v12 }
  0x46   :  { %1207 = vmatprep.mubr.msk.bf16.mxu1 %vm1304_vm0, %v1303_v12  ;;  %1192 = vmatpush3.bf16.msra.mxu1 %v1293_v21 }
  0x47   :  { %1193 = vmatprep.subr.bf16.mxu1 %v1303_v12 }
  0x48   :  { %1174 = vmatpush3.bf16.msra.mxu0 %v1286_v14 }
  0x49   :  { %1175 = vmatprep.subr.bf16.mxu0 %v1303_v12 }
  0x4a   :  { %1194 = vmatpush3.bf16.msra.mxu1 %v1294_v22 }
  0x4b   :  { %1195 = vmatprep.subr.bf16.mxu1 %v1303_v12 }
  0x4c   :  { %1176 = vmatpush3.bf16.msra.mxu0 %v1287_v15 }
  0x4d   :  { %1177 = vmatprep.subr.bf16.mxu0 %v1303_v12 }
  0x4e   :  { %1196 = vmatpush3.bf16.msra.mxu1 %v1295_v23 }
  0x4f   :  { %1197 = vmatprep.subr.bf16.mxu1 %v1303_v12 }
  0x50   :  { %1178 = vmatpush3.bf16.msra.mxu0 %v1288_v16 }
  0x51   :  { %1179 = vmatprep.subr.bf16.mxu0 %v1303_v12 }
  0x52   :  { %1198 = vmatpush3.bf16.msra.mxu1 %v1296_v24 }
  0x53   :  { %1199 = vmatprep.subr.bf16.mxu1 %v1303_v12 }
  0x54   :  { %1180 = vmatpush3.bf16.msra.mxu0 %v1289_v17 }
  0x55   :  { %1181 = vmatprep.subr.bf16.mxu0 %v1303_v12 }
  0x56   :  { %1200 = vmatpush3.bf16.msra.mxu1 %v1297_v25 }
  0x57   :  { %1201 = vmatprep.subr.bf16.mxu1 %v1303_v12 }
  0x58   :  { %1182 = vmatpush3.bf16.msra.mxu0 %v1290_v18 }
  0x59   :  { %1183 = vmatprep.subr.bf16.mxu0 %v1303_v12 }
  0x5a   :  { %1202 = vmatpush3.bf16.msra.mxu1 %v1298_v26 }
  0x5b   :  { %1203 = vmatprep.subr.bf16.mxu1 %v1303_v12 }
  0x5c   :  { %1184 = vmatpush3.bf16.msra.mxu0 %v1291_v19 }
  0x5d   :  { %1185 = vmatprep.subr.bf16.mxu0 %v1303_v12 }
  0x5e   :  { %1204 = vmatpush3.bf16.msra.mxu1 %v1299_v53 }
  0x5f   :  { %1205 = vmatprep.subr.bf16.mxu1 %v1303_v12 }
  0x60   :  { %1186 = vmatpush3.bf16.msra.mxu0 %v1292_v20 }
  0x62   :  { %1206 = vmatpush3.bf16.msra.mxu1 %v1300_v54 }
  0xf6   :  { %v1081_v27 = vpop.f32.mrb[0].mxu0 }
  0xf7   :  { %v1103_v28 = vpop.f32.mrb[0].mxu1  ;;  %v1082_v30 = vpop.f32.mrb[1].mxu0 }
  0xf8   :  { %v1104_v31 = vpop.f32.mrb[1].mxu1  ;;  %v1083_v32 = vadd.f32 %v1082_v30, %v1081_v27  ;;  %v1084_v34 = vpop.f32.mrb[2].mxu0 }
  0xf9   :  { %v1105_v33 = vadd.f32 %v1104_v31, %v1103_v28  ;;  %v1106_v35 = vpop.f32.mrb[2].mxu1  ;;  %v1085_v36 = vpop.f32.mrb[3].mxu0 }
  0xfa   :  { %v1107_v37 = vpop.f32.mrb[3].mxu1  ;;  %v613_v38 = vadd.f32 %v1083_v32, %v974_v29 }
  0xfc   :  { %v653_v39 = vadd.f32 %v1105_v33, %v613_v38 }
 0x116   :  { %v1125_v40 = vpop.f32.mrb[4].mxu0 }
 0x117   :  { %v1147_v41 = vpop.f32.mrb[4].mxu1  ;;  %v1126_v42 = vpop.f32.mrb[5].mxu0 }
 0x118   :  { %v1148_v43 = vpop.f32.mrb[5].mxu1  ;;  %v1127_v44 = vadd.f32 %v1126_v42, %v1125_v40  ;;  %v1128_v46 = vpop.f32.mrb[6].mxu0 }
 0x119   :  { %v1149_v45 = vadd.f32 %v1148_v43, %v1147_v41  ;;  %v1150_v47 = vpop.f32.mrb[6].mxu1  ;;  %v1129_v48 = vpop.f32.mrb[7].mxu0 }
 0x11a   :  { %v1151_v49 = vpop.f32.mrb[7].mxu1  ;;  %v693_v50 = vadd.f32 %v1127_v44, %v653_v39 }
 0x11c   :  { %v733_v51 = vadd.f32 %v1149_v45, %v693_v50 }
 0x11e   :  { %v738_v52 = vpack.c.bf16 %v733_v51, %v733_v51 }
 0x120   :  { %1188 = vmatmul.mubr.bf16.vlgmr.msra.gmra.mrb[8].mxu0 %v738_v52 }
 0x1f3   :  { %v844_v56 = vpop.f32.mrb[8].mxu0 }
 0x1f4   :  { %v845_v57 = vadd.f32 %v1047_v55, %v844_v56  ;;  %v1189_v58 = vpop.f32.mrb[9].mxu0 }
 0x1f5   :  { %v847_v59 = vpop.f32.mrb[10].mxu0 }
 0x1f6   :  { %v850_v60 = vmax.f32 %v845_v57, 0.0  ;;  %v1190_v61 = vpop.f32.mrb[11].mxu0 }
 0x1f8   :  { %v851_v62 = vpack.c.bf16 %v850_v60, %v850_v60 }
 0x1fa   :  { %1208 = vmatmul.mubr.bf16.vlgmr.msra.gmra.mrb[8].mxu1 %v851_v62 }
 0x2cd   :  { %v957_v0 = vpop.f32.mrb[8].mxu1 }
 0x2ce   :  { %v958_v1 = vadd.f32 %v1056_v63, %v957_v0  ;;  %v1209_v2 = vpop.f32.mrb[9].mxu1 }
 0x2cf   :  { %v960_v3 = vpop.f32.mrb[10].mxu1 }
 0x2d0   :  { %v1210_v4 = vpop.f32.mrb[11].mxu1  ;;  %v963_v5 = vmul.f32 %v958_v1, %v958_v1 }
 0x2d2   :  { %964 = vadd.xlane.f32.xlu0 %v963_v5 }
 0x35f   :  { %v965_v6 = vpop.xlane.xlu0 %964 }
 0x360   :  { %v966_v7 = vmax.f32 %v965_v6, 1e-24 }
 0x362   :  { %1301 = vrsqrt.f32 %v966_v7 }
 0x36c   :  { %v1302_v8 = vpop.eup %1301 }
 0x36d   :  { %v968_v9 = vmul.f32 %v1302_v8, %v958_v1 }
 0x36f   :  { %969 = vst [vmem:[%s1634_s7] sm:$0xff] %v968_v9 }

</bundles_post_ra>
